<compile_context>
chip_gen: v7x
topology: tpu7x:2x2x1
jax: 0.10.0
libtpu: 0.0.40
codegen_flags: <defaults>
</compile_context>

<pallas_src>
import functools

import jax
import jax.numpy as jnp
from jax.experimental import pallas as pl
from jax.experimental.pallas import tpu as pltpu


_VMEM_LIMIT_BYTES = 48 << 20   # safe on v7x (64 MiB), explicit for v5e (16 MiB default)
_TILE_M_MAX = 512
_TILE_N_MAX = 512


def _round_up(v, m):
    return ((v + m - 1) // m) * m


# ------------------------------------------------------------------ kernels --

def _linear_relu_kernel_fused(x_ref, w_ref, b_ref, o_ref, *, mxu_dtype):
    """Grid (Bp//tm, Cp//tn). Whole K resident in VMEM: single MXU pass +
    inline bias/ReLU epilogue. Both grid axes are 'parallel'."""
    x = x_ref[...].astype(mxu_dtype)                       # (tm, Dp)
    w = w_ref[...]                                         # (Dp, tn), pre-cast
    y = jnp.dot(x, w, preferred_element_type=jnp.float32) + b_ref[...]
    o_ref[...] = jnp.maximum(y, 0.0).astype(o_ref.dtype)


def _linear_relu_kernel_ksplit(x_ref, w_ref, b_ref, o_ref, *, mxu_dtype):
    """Grid (Bp//tm, Cp//tn, Dp//tk). Accumulates directly into the f32
    output block (resident across the K axis); bias+ReLU at k == last."""
    k = pl.program_id(2)

    @pl.when(k == 0)
    def _():
        o_ref[...] = jnp.zeros_like(o_ref)

    x = x_ref[...].astype(mxu_dtype)                       # (tm, tk)
    w = w_ref[...]                                         # (tk, tn), pre-cast
    o_ref[...] += jnp.dot(x, w, preferred_element_type=jnp.float32)

    @pl.when(k == pl.num_programs(2) - 1)
    def _():
        o_ref[...] = jnp.maximum(o_ref[...] + b_ref[...], 0.0)


# ------------------------------------------------------------------ planning --

def _plan_nd(D, C, mxu_dtype):
    """Tile / padding plan for the weight-side dims (independent of batch)."""
    tn = min(_TILE_N_MAX, _round_up(C, 128))
    Cp = _round_up(C, tn)
    fuse_k_max = 4096 if mxu_dtype == jnp.bfloat16 else 2048
    Dp128 = _round_up(D, 128)
    if Dp128 <= fuse_k_max:
        tk = None                   # fused-K path: whole K in one block
        Dp = Dp128
    else:
        tk = 2048 if mxu_dtype == jnp.bfloat16 else 1024
        Dp = _round_up(D, tk)
    return tn, tk, Dp, Cp


def _plan_m(B):
    tm = min(_TILE_M_MAX, _round_up(B, 8))
    Bp = _round_up(B, tm)
    return tm, Bp


# ------------------------------------------------------------------ wrappers --

def prepare_linear_params(w, b, *, use_bf16_mxu=True):
    """One-time relayout of nn.Linear params: W^T, padded, cast to the MXU
    operand dtype.  Hoisted out of the per-forward path."""
    C, D = w.shape
    mxu_dtype = jnp.bfloat16 if use_bf16_mxu else jnp.float32
    _, _, Dp, Cp = _plan_nd(D, C, mxu_dtype)
    wt = jnp.pad(jnp.asarray(w).T.astype(mxu_dtype), ((0, Dp - D), (0, Cp - C)))
    bias = jnp.pad(jnp.asarray(b).astype(jnp.float32), (0, Cp - C)).reshape(1, Cp)
    return {"wt": wt, "bias": bias, "in_features": D, "out_features": C,
            "mxu_dtype": mxu_dtype}


@functools.partial(jax.jit, static_argnames=("in_features", "out_features",
                                             "mxu_dtype"))
def _linear_relu_apply(x, wt, bias, *, in_features, out_features, mxu_dtype):
    B, D = x.shape
    C = out_features
    assert D == in_features, "input feature dim mismatch"

    tn, tk, Dp, Cp = _plan_nd(D, C, mxu_dtype)
    tm, Bp = _plan_m(B)
    assert wt.shape == (Dp, Cp) and bias.shape == (1, Cp)

    # Cast X for DMA only when it is reused across multiple N tiles (halves
    # the repeated X streaming); otherwise keep original dtype and fuse the
    # cast in-kernel (no extra HBM pass).
    n_tiles_n = Cp // tn
    x_dma_dtype = mxu_dtype if (n_tiles_n > 1 and x.dtype != mxu_dtype) else x.dtype
    x_p = jnp.pad(x.astype(x_dma_dtype), ((0, Bp - B), (0, Dp - D)))

    cost = pl.CostEstimate(
        flops=2 * B * D * C,
        transcendentals=0,
        bytes_accessed=int(x_p.size * x_p.dtype.itemsize
                           + wt.size * wt.dtype.itemsize
                           + bias.size * 4
                           + Bp * Cp * 4),
    )

    if tk is None:
        # -------- fused-K path: 2-D grid, one MXU pass per output tile -----
        grid = (Bp // tm, Cp // tn)
        out_p = pl.pallas_call(
            functools.partial(_linear_relu_kernel_fused, mxu_dtype=mxu_dtype),
            out_shape=jax.ShapeDtypeStruct((Bp, Cp), jnp.float32),
            grid_spec=pltpu.PrefetchScalarGridSpec(
                num_scalar_prefetch=0,
                grid=grid,
                in_specs=[
                    pl.BlockSpec((tm, Dp), lambda i, j: (i, 0)),   # X row-band
                    pl.BlockSpec((Dp, tn), lambda i, j: (0, j)),   # W^T col-band
                    pl.BlockSpec((1, tn), lambda i, j: (0, j)),    # bias
                ],
                out_specs=pl.BlockSpec((tm, tn), lambda i, j: (i, j)),
            ),
            compiler_params=pltpu.CompilerParams(
                dimension_semantics=("parallel", "parallel"),
                vmem_limit_bytes=_VMEM_LIMIT_BYTES,
            ),
            cost_estimate=cost,
        )(x_p, wt, bias)
    else:
        # -------- K-split path: 3-D grid, accumulate into the f32 output ---
        grid = (Bp // tm, Cp // tn, Dp // tk)
        out_p = pl.pallas_call(
            functools.partial(_linear_relu_kernel_ksplit, mxu_dtype=mxu_dtype),
            out_shape=jax.ShapeDtypeStruct((Bp, Cp), jnp.float32),
            grid_spec=pltpu.PrefetchScalarGridSpec(
                num_scalar_prefetch=0,
                grid=grid,
                in_specs=[
                    pl.BlockSpec((tm, tk), lambda i, j, k: (i, k)),
                    pl.BlockSpec((tk, tn), lambda i, j, k: (k, j)),
                    pl.BlockSpec((1, tn), lambda i, j, k: (0, j)),
                ],
                out_specs=pl.BlockSpec((tm, tn), lambda i, j, k: (i, j)),
            ),
            compiler_params=pltpu.CompilerParams(
                dimension_semantics=("parallel", "parallel", "arbitrary"),
                vmem_limit_bytes=_VMEM_LIMIT_BYTES,
            ),
            cost_estimate=cost,
        )(x_p, wt, bias)

    return out_p[:B, :C]


def linear_relu_prepared(x, params):
    """Forward pass using pre-transposed / pre-cast parameters."""
    return _linear_relu_apply(x, params["wt"], params["bias"],
                              in_features=params["in_features"],
                              out_features=params["out_features"],
                              mxu_dtype=params["mxu_dtype"])


def linear_relu(x, w, b, *, use_bf16_mxu=True):
    """ReLU(x.float() @ w.T + b) as a tiled Pallas kernel.

    x: (B, D) any numeric dtype (cast inside), w: (C, D), b: (C,).
    use_bf16_mxu=True  -> bf16 MXU operands, f32 accumulate (perf default).
    use_bf16_mxu=False -> f32 operands ("bit-parity" mode; still ~1e-6-level,
                          not bitwise, since the MXU has no native f32 path).
    """
    params = prepare_linear_params(w, b, use_bf16_mxu=use_bf16_mxu)
    return linear_relu_prepared(x, params)


def init_linear_params(key, input_dim, num_classes):
    """Deterministic init mirroring torch.nn.Linear (uniform +-1/sqrt(in))."""
    kw, kb = jax.random.split(key)
    bound = 1.0 / jnp.sqrt(jnp.float32(input_dim))
    w = jax.random.uniform(kw, (num_classes, input_dim), jnp.float32,
                           minval=-bound, maxval=bound)
    b = jax.random.uniform(kb, (num_classes,), jnp.float32,
                           minval=-bound, maxval=bound)
    return w, b


if __name__ == "__main__":
    key = jax.random.PRNGKey(0)
    k_x, k_p = jax.random.split(key)

    # Small shape matching the module spec (input_dim features, 2 classes).
    batch, input_dim, num_classes = 8, 32, 2
    x = jax.random.normal(k_x, (batch, input_dim), jnp.float32)
    w, b = init_linear_params(k_p, input_dim, num_classes)
    ref = jnp.maximum(x @ w.T + b, 0.0)

    # Default perf path: bf16 MXU operands, f32 accumulate, prepared params.
    params = prepare_linear_params(w, b, use_bf16_mxu=True)
    out = jax.block_until_ready(linear_relu_prepared(x, params))
    assert out.shape == (batch, num_classes)
    assert jnp.allclose(out, ref, atol=2e-2, rtol=2e-2), "bf16 path mismatch"

    # Bit-parity path (f32 operands).
    out32 = jax.block_until_ready(linear_relu(x, w, b, use_bf16_mxu=False))
    assert jnp.allclose(out32, ref, atol=1e-5, rtol=1e-5), "f32 path mismatch"

    # Multi-tile shape: multiple M and N tiles, fused-K path, wrapper bf16 X.
    B2, D2, C2 = 640, 1024, 640
    x2 = jax.random.normal(jax.random.PRNGKey(1), (B2, D2), jnp.float32)
    w2, b2 = init_linear_params(jax.random.PRNGKey(2), D2, C2)
    ref2 = jnp.maximum(x2 @ w2.T + b2, 0.0)
    out2 = jax.block_until_ready(linear_relu(x2, w2, b2))
    assert out2.shape == (B2, C2)
    rel_err = jnp.max(jnp.abs(out2 - ref2)) / (jnp.max(jnp.abs(ref2)) + 1e-9)
    assert rel_err < 2e-2, f"large-shape mismatch, rel_err={rel_err}"

    print("KERNEL_OK")
</pallas_src>

<mosaic_0001>
module attributes {stable_mosaic.version = 11 : i64} {
  func.func @_linear_relu_kernel_fused(%arg0: i32, %arg1: i32, %arg2: memref<8x128xf32, #tpu.memory_space<vmem>>, %arg3: memref<128x128xbf16, #tpu.memory_space<vmem>>, %arg4: memref<1x128xf32, #tpu.memory_space<vmem>>, %arg5: memref<8x128xf32, #tpu.memory_space<vmem>>) attributes {dimension_semantics = [#tpu.dimension_semantics<parallel>, #tpu.dimension_semantics<parallel>], iteration_bounds = array<i64: 1, 1>, scalar_prefetch = 0 : i64, scratch_operands = 0 : i64, tpu.core_type = #tpu.core_type<tc>, window_params = [{transform_indices = @transform_0, window_bounds = array<i64: 8, 128>}, {transform_indices = @transform_1, window_bounds = array<i64: 128, 128>}, {transform_indices = @transform_2, window_bounds = array<i64: 1, 128>}, {transform_indices = @transform_3, window_bounds = array<i64: 8, 128>}]} {
    %c0 = arith.constant 0 : index
    %c0_0 = arith.constant 0 : index
    %0 = vector.load %arg2[%c0, %c0_0] : memref<8x128xf32, #tpu.memory_space<vmem>>, vector<8x128xf32>
    %1 = arith.truncf %0 : vector<8x128xf32> to vector<8x128xbf16>
    %c0_1 = arith.constant 0 : index
    %c0_2 = arith.constant 0 : index
    %2 = vector.load %arg3[%c0_1, %c0_2] : memref<128x128xbf16, #tpu.memory_space<vmem>>, vector<128x128xbf16>
    %cst = arith.constant dense<0.000000e+00> : vector<8x128xf32>
    %3 = tpu.matmul %1, %2, %cst {dimension_numbers = #tpu.dot_dimension_numbers<[1], [0], [0], [1], [0, 0, 1, 1], [], []>} : vector<8x128xbf16>, vector<128x128xbf16>, vector<8x128xf32> -> vector<8x128xf32>
    %c0_3 = arith.constant 0 : index
    %c0_4 = arith.constant 0 : index
    %4 = vector.load %arg4[%c0_3, %c0_4] : memref<1x128xf32, #tpu.memory_space<vmem>>, vector<1x128xf32>
    %5 = vector.broadcast %4 : vector<1x128xf32> to vector<8x128xf32>
    %6 = arith.addf %3, %5 : vector<8x128xf32>
    %cst_5 = arith.constant 0.000000e+00 : f32
    %7 = vector.broadcast %cst_5 : f32 to vector<8x128xf32>
    %8 = arith.maximumf %6, %7 : vector<8x128xf32>
    %c0_6 = arith.constant 0 : index
    %c0_7 = arith.constant 0 : index
    %9 = vector.load %arg5[%c0_6, %c0_7] : memref<8x128xf32, #tpu.memory_space<vmem>>, vector<8x128xf32>
    tpu.vector_store %arg5[%c0_6, %c0_7], %8 {strides = array<i32>} : memref<8x128xf32, #tpu.memory_space<vmem>>, vector<8x128xf32>,
    return
  }
  func.func @transform_0(%arg0: i32, %arg1: i32) -> (i32, i32) {
    %c0_i32 = arith.constant 0 : i32
    %c0_i32_0 = arith.constant 0 : i32
    return %arg0, %c0_i32 : i32, i32
  }
  func.func @transform_1(%arg0: i32, %arg1: i32) -> (i32, i32) {
    %c0_i32 = arith.constant 0 : i32
    %c0_i32_0 = arith.constant 0 : i32
    return %c0_i32, %arg1 : i32, i32
  }
  func.func @transform_2(%arg0: i32, %arg1: i32) -> (i32, i32) {
    %c0_i32 = arith.constant 0 : i32
    %c0_i32_0 = arith.constant 0 : i32
    return %c0_i32, %arg1 : i32, i32
  }
  func.func @transform_3(%arg0: i32, %arg1: i32) -> (i32, i32) {
    %c0_i32 = arith.constant 0 : i32
    return %arg0, %arg1 : i32, i32
  }
}

</mosaic_0001>

<bundles_post_ra>
// kernel: _linear_relu_apply.1
= control target key start
LH: loop header
LB: loop body
LE: loop exit
PB: predicated region body
PF: predicated region fallthrough
CT: control target
= control target key end

     0   :  { %8 = vsyncpa [#allocation3], 0  ;;  %s224_s12 = smov [#allocation2]   ;;  %s270_s0 = inlined_call_operand.vmem [shape: f32[8,128], index: 0, kind: input, shape index: {}]   ;;  %s271_s1 = inlined_call_operand.hbm [shape: bf16[128,128], index: 1, kind: input, shape index: {}]   ;;  %s272_s2 = inlined_call_operand.vmem [shape: f32[1,128], index: 2, kind: input, shape index: {}]   ;;  %s273_s3 = inlined_call_operand.vmem [shape: f32[8,128], index: 3, kind: output, shape index: {}]  }
   0x1   :  { %s16_s13 = sshll.u32 %s224_s12, 4  ;;  %s200_s16 = scalar_lea.hbm %s271_s1, 1024  ;;  %s17_s13 = int_to_ptr.vmem [resolvable:$true] %s16_s13 }
   0x2   :  { %p201_p0 = scmp.ne.s32.totalorder %s271_s1, %s200_s16  ;;  %p204_p1 = scmp.lt.u32.totalorder %s200_s16, %s271_s1 }
   0x4   :  { %p206_p2 = pnand %p204_p1, %p201_p0 }
   0x6   :  { %209 = shalt.err (!%p206_p2)
}
   0x7   :  { %s210_s21 = scalar_lea.vmem %s17_s13, 1024  ;;  %p215_p4 = scmp.lt.s32.totalorder %s17_s13, %s17_s13 }
   0x8   :  { %p211_p3 = scmp.ne.s32.totalorder %s17_s13, %s210_s21  ;;  %p216_p5 = scmp.lt.s32.totalorder %s210_s21, %s210_s21 }
   0xa   :  { %p217_p6 = por %p216_p5, %p215_p4 }
   0xc   :  { %p218_p7 = pnand %p217_p6, %p211_p3 }
   0xe   :  { %221 = shalt.err (!%p218_p7)
}
   0xf   :  { %s225_s22 = smov 64   ;;  %s226_s23 = smov 4  }
  0x10   :  { %22 = dma.hbm_to_vmem [thread:$0]  %s271_s1, 1024, %s17_s13, [#allocation3], %s225_s22, %s225_s22, %s226_s23  }
  0x11   :  { %222 = dma.done.wait [#allocation3], 1024  }
  0x12   :  { %223 = vsyncadd [#allocation3], 4294966272  ;;  %v227_v0 = vmov 0.0   ;;  %vm228_vm0 = vmmov 0   ;;  %v192_v1 = vld [vmem:[#allocation2] sm:$0xff]   ;;  %v193_v2 = vld [vmem:[#allocation2 + $0x8] sm:$0xff]  }
  0x13   :  { %167 = vmatprep.subr.bf16.mxu0 %v227_v0  ;;  %183 = vmatprep.mubr.msk.bf16.mxu0 %vm228_vm0, %v227_v0  ;;  %v194_v3 = vld [vmem:[#allocation2 + $0x10] sm:$0xff]   ;;  %v195_v4 = vld [vmem:[#allocation2 + $0x18] sm:$0xff]   ;;  %v196_v5 = vld [vmem:[#allocation2 + $0x20] sm:$0xff]  }
  0x14   :  { %168 = vmatpush3.bf16.msra.mxu0 %v192_v1  ;;  %v197_v6 = vld [vmem:[#allocation2 + $0x28] sm:$0xff]   ;;  %v198_v7 = vld [vmem:[#allocation2 + $0x30] sm:$0xff]   ;;  %v199_v8 = vld [vmem:[#allocation2 + $0x38] sm:$0xff]  }
  0x15   :  { %169 = vmatprep.subr.bf16.mxu0 %v227_v0  ;;  %v29_v9 = vld [vmem:[%s270_s0] sm:$0xff] }
  0x16   :  { %v30_v10 = vpack.c.bf16 %v29_v9, %v29_v9  ;;  %v149_v11 = vld [vmem:[%s272_s2] ss:$0 sm:$0xff] }
  0x18   :  { %170 = vmatpush3.bf16.msra.mxu0 %v193_v2 }
  0x19   :  { %171 = vmatprep.subr.bf16.mxu0 %v227_v0 }
  0x1c   :  { %172 = vmatpush3.bf16.msra.mxu0 %v194_v3 }
  0x1d   :  { %173 = vmatprep.subr.bf16.mxu0 %v227_v0 }
  0x20   :  { %174 = vmatpush3.bf16.msra.mxu0 %v195_v4 }
  0x21   :  { %175 = vmatprep.subr.bf16.mxu0 %v227_v0 }
  0x24   :  { %176 = vmatpush3.bf16.msra.mxu0 %v196_v5 }
  0x25   :  { %177 = vmatprep.subr.bf16.mxu0 %v227_v0 }
  0x28   :  { %178 = vmatpush3.bf16.msra.mxu0 %v197_v6 }
  0x29   :  { %179 = vmatprep.subr.bf16.mxu0 %v227_v0 }
  0x2c   :  { %180 = vmatpush3.bf16.msra.mxu0 %v198_v7 }
  0x2d   :  { %181 = vmatprep.subr.bf16.mxu0 %v227_v0 }
  0x30   :  { %182 = vmatpush3.bf16.msra.mxu0 %v199_v8 }
  0x33   :  { %184 = vmatmul.mubr.bf16.vlgmr.msra.gmra.mrb[0].mxu0 %v30_v10 }
 0x106   :  { %v136_v12 = vpop.f32.mrb[0].mxu0 }
 0x107   :  { %v137_v13 = vadd.f32 %v149_v11, %v136_v12  ;;  %v185_v14 = vpop.f32.mrb[1].mxu0 }
 0x108   :  { %v139_v15 = vpop.f32.mrb[2].mxu0 }
 0x109   :  { %v142_v16 = vmax.f32 %v137_v13, 0.0  ;;  %v186_v17 = vpop.f32.mrb[3].mxu0 }
 0x10b   :  { %143 = vst [vmem:[%s273_s3] sm:$0xff] %v142_v16 }
 0x10c   :  { %148 = vsyncpa [#allocation3], 1 }

</bundles_post_ra>
